<compile_context>
chip_gen: v5e
topology: v5e:2x2
jax: 0.10.0
libtpu: 0.0.40
codegen_flags: <defaults>
</compile_context>

<pallas_src>
import jax
import jax.numpy as jnp
from jax.experimental import pallas as pl
from jax.experimental.pallas import tpu as pltpu


def _round_up(x, m):
    return ((x + m - 1) // m) * m


_HAS_BUFFERED = hasattr(pl, "Buffered")


def _block_spec(shape, index_map, buffers=None):
    """BlockSpec with an optional explicit buffer count (graceful fallback)."""
    if buffers is not None and _HAS_BUFFERED:
        try:
            return pl.BlockSpec(shape, index_map, pipeline_mode=pl.Buffered(buffers))
        except TypeError:
            pass
    return pl.BlockSpec(shape, index_map)


def _head_kernel(x_ref, w1_ref, b1_ref, w2_ref, b2_ref, o_ref):
    # Fused: dense -> tanh -> out_proj, all in VMEM, matmuls on the MXU.
    # Cast activations to the weight dtype so bf16 weights hit the full-rate
    # bf16 MXU path; accumulation stays in f32.
    x = x_ref[...].astype(w1_ref.dtype)
    h = jnp.dot(x, w1_ref[...], preferred_element_type=jnp.float32)
    h = jnp.tanh(h + b1_ref[...].astype(jnp.float32))          # EUP tanh in f32
    h = h.astype(w2_ref.dtype)                                  # back to operand dtype for MXU
    y = jnp.dot(h, w2_ref[...], preferred_element_type=jnp.float32)
    y = y + b2_ref[...].astype(jnp.float32)
    o_ref[...] = y.astype(o_ref.dtype)


def prepare_head_params(w_dense, b_dense, w_out, b_out, *, param_dtype=None):
    """One-time weight prep (NOT per forward call).

    w_dense: [H, H] in [in, out] layout (transpose of torch dense.weight [out, in]).
    w_out:   [H, L] in [in, out] layout.
    b_dense: [H] or [1, H];  b_out: [L] or [1, L].

    Pads the label dim to a lane-dense multiple of 128 and optionally casts the
    weight matrices to param_dtype (bf16 recommended for H >= 768: halves weight
    HBM traffic and doubles the MXU rate; biases stay in their original dtype —
    the kernel adds them in f32).
    """
    H = w_dense.shape[0]
    L = w_out.shape[1]
    assert w_dense.shape == (H, H), "w_dense must be [H, H] in [in, out] layout"
    assert w_out.shape == (H, L), "w_out must be [H, L] in [in, out] layout"
    b_dense = jnp.reshape(b_dense, (1, H))
    b_out = jnp.reshape(b_out, (1, L))
    L_pad = _round_up(max(L, 128), 128)
    if L_pad != L:
        w_out = jnp.pad(w_out, ((0, 0), (0, L_pad - L)))
        b_out = jnp.pad(b_out, ((0, 0), (0, L_pad - L)))
    if param_dtype is not None:
        w_dense = w_dense.astype(param_dtype)
        w_out = w_out.astype(param_dtype)
    return {"w_dense": w_dense, "b_dense": b_dense,
            "w_out": w_out, "b_out": b_out, "num_labels": L}


def _xla_head(features, params):
    """Plain XLA path for tiny batches (weight-DMA / launch-overhead dominated)."""
    w1, b1 = params["w_dense"], params["b_dense"]
    w2, b2 = params["w_out"], params["b_out"]
    L = params["num_labels"]
    x = features.astype(w1.dtype)
    h = jnp.tanh(jnp.dot(x, w1, preferred_element_type=jnp.float32)
                 + b1.astype(jnp.float32))
    y = jnp.dot(h.astype(w2.dtype), w2, preferred_element_type=jnp.float32) \
        + b2.astype(jnp.float32)
    return y[:, :L].astype(features.dtype)


def _pick_vmem_limit(TB, H, L_pad, x_itemsize, w_itemsize):
    # Double-buffered activation/output tiles + resident weights (budget 2x in
    # case single-buffering of constants is unavailable) + slack.
    stream = 2 * TB * (H + L_pad) * x_itemsize
    weights = (H * H + H * L_pad) * w_itemsize + (H + L_pad) * 4
    need = stream + 2 * weights + (2 << 20)
    try:
        cap = getattr(pltpu.get_tpu_info(), "vmem_capacity_bytes", 0) or (64 << 20)
    except Exception:
        cap = 64 << 20
    ceiling = (cap * 3) // 4   # ~48 MiB on v7x (64 MiB/TC), ~96 MiB on v5e/v6e
    return int(min(max(need * 3 // 2, 16 << 20), ceiling))


def wav2vec2_classification_head(features, params, *, block_b=256,
                                 small_batch_fallback=8):
    """features: [B, H]; params from prepare_head_params(). Returns [B, num_labels]."""
    B, H = features.shape
    w1, b1 = params["w_dense"], params["b_dense"]
    w2, b2 = params["w_out"], params["b_out"]
    L = params["num_labels"]
    L_pad = w2.shape[1]
    assert w1.shape == (H, H), "w_dense must be [H, H] in [in, out] layout"
    assert w2.shape[0] == H

    # Tiny batches: one grid step dominated by the H*H weight DMA -> plain XLA.
    if small_batch_fallback is not None and B <= small_batch_fallback:
        return _xla_head(features, params)

    # Balanced batch tiles (no 2x padding for B just past a tile boundary) and
    # >= 2 grid steps whenever B allows, so "parallel" engages both v7x cores.
    num_tiles = pl.cdiv(B, block_b)
    if num_tiles == 1 and B >= 16:
        num_tiles = 2
    TB = _round_up(pl.cdiv(B, num_tiles), 8)
    grid = pl.cdiv(B, TB)   # ragged final tile handled by Pallas write-masking

    x_isz = jnp.dtype(features.dtype).itemsize
    w_isz = jnp.dtype(w1.dtype).itemsize
    b_isz = jnp.dtype(b1.dtype).itemsize

    cost = pl.CostEstimate(
        flops=2 * B * H * (H + L_pad),
        transcendentals=B * H,
        bytes_accessed=(B * H * x_isz                 # x
                        + H * H * w_isz               # w_dense
                        + H * L_pad * w_isz           # w_out
                        + (H + L_pad) * b_isz         # biases
                        + B * L_pad * x_isz),         # out
    )

    out = pl.pallas_call(
        _head_kernel,
        out_shape=jax.ShapeDtypeStruct((B, L_pad), features.dtype),
        grid_spec=pl.GridSpec(
            grid=(grid,),
            in_specs=[
                # Activations: streamed per batch tile (double-buffered).
                _block_spec((TB, H), lambda i: (i, 0)),
                # Weights / biases: constant index_map -> VMEM-resident,
                # single-buffered (double-buffering a constant is pure waste).
                _block_spec((H, H), lambda i: (0, 0), buffers=1),
                _block_spec((1, H), lambda i: (0, 0), buffers=1),
                _block_spec((H, L_pad), lambda i: (0, 0), buffers=1),
                _block_spec((1, L_pad), lambda i: (0, 0), buffers=1),
            ],
            out_specs=_block_spec((TB, L_pad), lambda i: (i, 0)),
        ),
        compiler_params=pltpu.CompilerParams(
            dimension_semantics=("parallel",),
            vmem_limit_bytes=_pick_vmem_limit(TB, H, L_pad, x_isz, w_isz),
        ),
        cost_estimate=cost,
    )(features, w1, b1, w2, b2)

    return out[:, :L]


if __name__ == "__main__":
    # Config: hidden_size=32, num_labels=5 (small, consistent shapes).
    H, L = 32, 5
    key = jax.random.PRNGKey(0)
    k_x, k_w1, k_b1, k_w2, k_b2, k_x2 = jax.random.split(key, 6)

    # Synthetic params, [in, out] layout (transpose of torch nn.Linear.weight).
    w_dense = jax.random.normal(k_w1, (H, H), jnp.float32) * 0.05
    b_dense = jax.random.normal(k_b1, (H,), jnp.float32) * 0.01
    w_out = jax.random.normal(k_w2, (H, L), jnp.float32) * 0.05
    b_out = jax.random.normal(k_b2, (L,), jnp.float32) * 0.01

    def ref_head(x):
        return jnp.tanh(x @ w_dense + b_dense[None, :]) @ w_out + b_out[None, :]

    params_f32 = prepare_head_params(w_dense, b_dense, w_out, b_out)

    # 1) Pallas path, batch divides the tile exactly (grid = 2 -> dual-TC split).
    x16 = jax.random.normal(k_x, (16, H), jnp.float32)
    out16 = jax.block_until_ready(wav2vec2_classification_head(x16, params_f32))
    assert out16.shape == (16, L)
    assert jnp.allclose(out16, ref_head(x16), atol=1e-5, rtol=1e-5)

    # 2) Pallas path with a ragged final batch tile (write-masked, no wrapper pad).
    x20 = jax.random.normal(k_x2, (20, H), jnp.float32)
    out20 = jax.block_until_ready(wav2vec2_classification_head(x20, params_f32))
    assert out20.shape == (20, L)
    assert jnp.allclose(out20, ref_head(x20), atol=1e-5, rtol=1e-5)

    # 3) bf16 weight fast path (activations cast to bf16 inside the kernel,
    #    f32 accumulation) — looser tolerance vs the f32 reference.
    params_bf16 = prepare_head_params(w_dense, b_dense, w_out, b_out,
                                      param_dtype=jnp.bfloat16)
    out_bf16 = jax.block_until_ready(wav2vec2_classification_head(x16, params_bf16))
    assert out_bf16.shape == (16, L)
    assert jnp.allclose(out_bf16, ref_head(x16), atol=1e-1, rtol=1e-1)

    # 4) Tiny-batch XLA fallback (B <= small_batch_fallback).
    x4 = x16[:4]
    out4 = jax.block_until_ready(wav2vec2_classification_head(x4, params_f32))
    assert out4.shape == (4, L)
    assert jnp.allclose(out4, ref_head(x4), atol=1e-5, rtol=1e-5)

    print("KERNEL_OK")
</pallas_src>

<mosaic_0001>
module attributes {stable_mosaic.version = 11 : i64} {
  func.func @_head_kernel(%arg0: i32, %arg1: memref<8x32xf32, #tpu.memory_space<vmem>>, %arg2: memref<32x32xf32, #tpu.memory_space<vmem>>, %arg3: memref<1x32xf32, #tpu.memory_space<vmem>>, %arg4: memref<32x128xf32, #tpu.memory_space<vmem>>, %arg5: memref<1x128xf32, #tpu.memory_space<vmem>>, %arg6: memref<8x128xf32, #tpu.memory_space<vmem>>) attributes {dimension_semantics = [#tpu.dimension_semantics<parallel>], iteration_bounds = array<i64: 2>, scalar_prefetch = 0 : i64, scratch_operands = 0 : i64, tpu.core_type = #tpu.core_type<tc>, window_params = [{transform_indices = @transform_0, window_bounds = array<i64: 8, 32>}, {pipeline_mode = #tpu.pipeline_mode<synchronous>, transform_indices = @transform_1, window_bounds = array<i64: 32, 32>}, {pipeline_mode = #tpu.pipeline_mode<synchronous>, transform_indices = @transform_2, window_bounds = array<i64: 1, 32>}, {pipeline_mode = #tpu.pipeline_mode<synchronous>, transform_indices = @transform_3, window_bounds = array<i64: 32, 128>}, {pipeline_mode = #tpu.pipeline_mode<synchronous>, transform_indices = @transform_4, window_bounds = array<i64: 1, 128>}, {transform_indices = @transform_5, window_bounds = array<i64: 8, 128>}]} {
    %c0 = arith.constant 0 : index
    %c0_0 = arith.constant 0 : index
    %0 = vector.load %arg1[%c0, %c0_0] : memref<8x32xf32, #tpu.memory_space<vmem>>, vector<8x32xf32>
    %c0_1 = arith.constant 0 : index
    %c0_2 = arith.constant 0 : index
    %1 = vector.load %arg2[%c0_1, %c0_2] : memref<32x32xf32, #tpu.memory_space<vmem>>, vector<32x32xf32>
    %cst = arith.constant dense<0.000000e+00> : vector<8x32xf32>
    %2 = tpu.matmul %0, %1, %cst {dimension_numbers = #tpu.dot_dimension_numbers<[1], [0], [0], [1], [0, 0, 1, 1], [], []>} : vector<8x32xf32>, vector<32x32xf32>, vector<8x32xf32> -> vector<8x32xf32>
    %c0_3 = arith.constant 0 : index
    %c0_4 = arith.constant 0 : index
    %3 = vector.load %arg3[%c0_3, %c0_4] : memref<1x32xf32, #tpu.memory_space<vmem>>, vector<1x32xf32>
    %4 = vector.broadcast %3 : vector<1x32xf32> to vector<8x32xf32>
    %5 = arith.addf %2, %4 : vector<8x32xf32>
    %6 = math.tanh %5 : vector<8x32xf32>
    %c0_5 = arith.constant 0 : index
    %c0_6 = arith.constant 0 : index
    %7 = vector.load %arg4[%c0_5, %c0_6] : memref<32x128xf32, #tpu.memory_space<vmem>>, vector<32x128xf32>
    %cst_7 = arith.constant dense<0.000000e+00> : vector<8x128xf32>
    %8 = tpu.matmul %6, %7, %cst_7 {dimension_numbers = #tpu.dot_dimension_numbers<[1], [0], [0], [1], [0, 0, 1, 1], [], []>} : vector<8x32xf32>, vector<32x128xf32>, vector<8x128xf32> -> vector<8x128xf32>
    %c0_8 = arith.constant 0 : index
    %c0_9 = arith.constant 0 : index
    %9 = vector.load %arg5[%c0_8, %c0_9] : memref<1x128xf32, #tpu.memory_space<vmem>>, vector<1x128xf32>
    %10 = vector.broadcast %9 : vector<1x128xf32> to vector<8x128xf32>
    %11 = arith.addf %8, %10 : vector<8x128xf32>
    %c0_10 = arith.constant 0 : index
    %c0_11 = arith.constant 0 : index
    %12 = vector.load %arg6[%c0_10, %c0_11] : memref<8x128xf32, #tpu.memory_space<vmem>>, vector<8x128xf32>
    tpu.vector_store %arg6[%c0_10, %c0_11], %11 {strides = array<i32>} : memref<8x128xf32, #tpu.memory_space<vmem>>, vector<8x128xf32>,
    return
  }
  func.func @transform_0(%arg0: i32) -> (i32, i32) {
    %c0_i32 = arith.constant 0 : i32
    %c0_i32_0 = arith.constant 0 : i32
    return %arg0, %c0_i32 : i32, i32
  }
  func.func @transform_1(%arg0: i32) -> (i32, i32) {
    %c0_i32 = arith.constant 0 : i32
    %c0_i32_0 = arith.constant 0 : i32
    %c0_i32_1 = arith.constant 0 : i32
    return %c0_i32, %c0_i32_0 : i32, i32
  }
  func.func @transform_2(%arg0: i32) -> (i32, i32) {
    %c0_i32 = arith.constant 0 : i32
    %c0_i32_0 = arith.constant 0 : i32
    %c0_i32_1 = arith.constant 0 : i32
    return %c0_i32, %c0_i32_0 : i32, i32
  }
  func.func @transform_3(%arg0: i32) -> (i32, i32) {
    %c0_i32 = arith.constant 0 : i32
    %c0_i32_0 = arith.constant 0 : i32
    %c0_i32_1 = arith.constant 0 : i32
    return %c0_i32, %c0_i32_0 : i32, i32
  }
  func.func @transform_4(%arg0: i32) -> (i32, i32) {
    %c0_i32 = arith.constant 0 : i32
    %c0_i32_0 = arith.constant 0 : i32
    %c0_i32_1 = arith.constant 0 : i32
    return %c0_i32, %c0_i32_0 : i32, i32
  }
  func.func @transform_5(%arg0: i32) -> (i32, i32) {
    %c0_i32 = arith.constant 0 : i32
    %c0_i32_0 = arith.constant 0 : i32
    return %arg0, %c0_i32 : i32, i32
  }
}

</mosaic_0001>

<bundles_post_ra>
// kernel: tpu_custom_call.1
= control target key start
LH: loop header
LB: loop body
LE: loop exit
PB: predicated region body
PF: predicated region fallthrough
CT: control target
= control target key end

     0   :  { %10 = vsyncpa [#allocation3], 0  ;;  %s890_s0 = inlined_call_operand.hbm [shape: f32[16,32], index: 0, kind: input, shape index: {}]   ;;  %s891_s1 = inlined_call_operand.hbm [shape: f32[32,32], index: 1, kind: input, shape index: {}]   ;;  %s892_s2 = inlined_call_operand.vmem [shape: f32[1,32], index: 2, kind: input, shape index: {}]   ;;  %s893_s3 = inlined_call_operand.hbm [shape: f32[32,128], index: 3, kind: input, shape index: {}]   ;;  %s894_s4 = inlined_call_operand.vmem [shape: f32[1,128], index: 4, kind: input, shape index: {}]   ;;  %s895_s5 = inlined_call_operand.hbm [shape: f32[16,128], index: 5, kind: output, shape index: {}]  }
   0x1   :  { %12 = vsyncpa [#allocation3 + $0x1], 0 }
   0x2   :  { %13 = vsyncpa [#allocation6], 0 }
   0x3   :  { %14 = vsyncpa [#allocation4], 0 }
   0x4   :  { %16 = vsyncpa [#allocation4 + $0x1], 0  ;;  %s733_s18 = smov 0   ;;  %s735_s19 = smov 0  }
   0x5   :  { %s737_s20 = smov 0   ;;  %s739_s21 = smov 0  }
   0x6 LB: > { %s174_s24 = sshll.u32 %s891_s1, 4  ;;  %s757_s25 = sadd.s32 4294967295, %s697_s21   ;;  %s697_s21 = sphi %s739_s21, %s906_s21   ;;  %s693_s20 = sphi %s737_s20, %s905_s20   ;;  %s689_s19 = sphi %s735_s19, %s904_s19   ;;  %s685_s18 = sphi %s733_s18, %s903_s18   ;;  %s175_s24 = int_to_ptr.hbm [resolvable:$true] %s174_s24 }
   0x7   : > { %p447_p0 = scmp.ge.s32.totalorder %s697_s21, 1  ;;  %p43_p1 = scmp.eq.s32.totalorder %s757_s25, 0 }
   0x8   : > { %p163_p2 = scmp.lt.s32.totalorder %s697_s21, 3  ;;  %s699_s27 = smov [#allocation5]  }
   0x9   : > { %s176_s28 = sshll.u32 %s699_s27, 4  ;;  %s191_s6 = sshll.u32 %s893_s3, 4  ;;  %s177_s28 = int_to_ptr.vmem [resolvable:$true] %s176_s28  ;;  %s192_s6 = int_to_ptr.hbm [resolvable:$true] %s191_s6 }
   0xa   : > { %p762_p3 = pnand %p447_p0, %p163_p2  ;;  %s700_s7 = smov [#allocation7]  }
   0xb   : > { %s193_s8 = sshll.u32 %s700_s7, 4  ;;  %s701_s9 = smov 128   ;;  %s194_s8 = int_to_ptr.vmem [resolvable:$true] %s193_s8 }
   0xc   : > { %p476_p4 = pneg %p762_p3  ;;  %s702_s10 = smov 8  }
   0xd   : > { %s446_s11 = sadd.s32 4294967294, %s697_s21   ;;  %s776_s12 = sadd.s32 1, %s697_s21  }
   0xe   : > { %p477_p6 = pnand %p476_p4, %p43_p1  ;;  %s26_s13 = ssub.s32 %s697_s21, %s776_s12 }
   0xf   : > { %s29_s14 = sadd.s32 1, %s693_s20  ;;  %p27_p7 = scmp.eq.s32.totalorder %s26_s13, 0 }
  0x10   : > { %479 = dma.hbm_to_vmem [thread:$0]  (!%p477_p6), %s175_s24, 512, %s177_s28, [#allocation6], %s701_s9, %s701_s9, %s702_s10  }
  0x11   : > { %482 = dma.hbm_to_vmem [thread:$0]  (!%p477_p6), %s192_s6, 512, %s194_s8, [#allocation6], %s701_s9, %s701_s9, %s702_s10  }
  0x12   : > { %p36_p8 = scmp.ne.s32.totalorder %s693_s20, %s689_s19  ;;  %p37_p9 = scmp.eq.s32.totalorder %s697_s21, 0 }
  0x13   : > { %p42_p10 = scmp.ne.s32.totalorder %s689_s19, %s685_s18  ;;  %p150_p13 = scmp.eq.s32.totalorder %s757_s25, 1 }
  0x14   : > { %s787_s15 = scalar_select %p27_p7, %s693_s20, %s29_s14  }
  0x15   : > { %p789_p11 = por %p37_p9, %p36_p8  ;;  %p795_p12 = por %p43_p1, %p42_p10 }
  0x16   : > { %p156_p0 = scmp.eq.s32.totalorder %s446_s11, 1  ;;  %p493_p2 = scmp.lt.s32.totalorder %s697_s21, 2 }
  0x17   : > { %s210_s22 = sand.u32 1, %s693_s20   ;;  %p802_p4 = por %p150_p13, %p36_p8 }
  0x18   : > { %p806_p6 = por %p156_p0, %p42_p10  ;;  %s451_s27 = sshll.u32 %s210_s22, 3 }
  0x19   : > { %s452_s28 = sshll.u32 %s697_s21, 3  ;;  %s214_s7 = scalar_lea.vmem [#allocation2], %s451_s27 }
  0x1a   : > { %s218_s6 = scalar_lea.hbm %s890_s0, %s452_s28  ;;  %s222_s8 = sshll.u32 %s214_s7, 4  ;;  %s223_s8 = int_to_ptr.vmem [resolvable:$true] %s222_s8 }
  0x1b   : > { %s220_s9 = sshll.u32 %s218_s6, 4  ;;  %p816_p7 = pnand %p493_p2, %p789_p11  ;;  %s221_s9 = int_to_ptr.hbm [resolvable:$true] %s220_s9 }
  0x1c   : > { %s211_s11 = scalar_lea.sflag [#allocation3], %s210_s22  ;;  %s597_s13 = sshra.s32 %s221_s9, 4  ;;  %s598_s13 = int_to_ptr.hbm [resolvable:$true] %s597_s13 }
  0x1d   : > { %s599_s14 = scalar_lea.hbm %s598_s13, 8  ;;  %p601_p9 = pneg %p816_p7 }
  0x1e   : > { %p600_p8 = scmp.ne.s32.totalorder %s598_s13, %s599_s14  ;;  %s604_s29 = scalar_lea.hbm %s890_s0, 16 }
  0x1f   : > { %p605_p11 = scmp.lt.s32.totalorder %s598_s13, %s890_s0  ;;  %p606_p0 = scmp.lt.s32.totalorder %s604_s29, %s599_s14 }
  0x20   : > { %p602_p10 = pnand %p601_p9, %p600_p8 }
  0x21   : > { %p607_p2 = por %p606_p0, %p605_p11 }
  0x22   : > { %p603_p13 = pneg %p602_p10 }
  0x24   : > { %p608_p5 = pnand %p607_p2, %p603_p13 }
  0x26   : > { %611 = shalt.err (!%p608_p5)
}
  0x27   : > { %486 = dma.hbm_to_vmem [thread:$0]  (!%p816_p7), %s221_s9, 128, %s223_s8, %s211_s11  }
  0x28   : > { %231 = sbr.rel (%p762_p3) target bundleno = 322 (0x142), region = 40  ;;  %s833_s22 = sand.u32 (!%p762_p3), 1, %s689_s19  }
  0x29   : > { %s454_s6 = sshll.u32 (!%p762_p3), %s833_s22, 3  ;;  %s234_s7 = scalar_lea.sflag (!%p762_p3), [#allocation3], %s833_s22 }
  0x2a   : > { %s237_s13 = scalar_lea.vmem (!%p762_p3), [#allocation2], %s454_s6 }
  0x2d   : > { %672 = dma.done.wait (%p795_p12), %s234_s7, 128  }
  0x2e   : > { %674 = vsyncadd (%p795_p12), %s234_s7, 4294967168 }
  0x2f   : > { %676 = dma.done.wait (%p43_p1), [#allocation6], 1024  }
  0x30   : > { %678 = vsyncadd (%p43_p1), [#allocation6], 4294966272  ;;  %v279_v0 = vld [vmem:[#allocation5 + $0x18] sm:$0xff]  ;;  %v278_v1 = vld [vmem:[#allocation5 + $0x10] sm:$0xff]  ;;  %vm284_vm0 = vcmask 261120   ;;  %s461_s8 = sshll.u32 %s757_s25, 3 }
  0x31   : > { %300 = vmatpush.msra.mxu0 %v279_v0  ;;  %v277_v2 = vld [vmem:[#allocation5 + $0x8] sm:$0xff]  ;;  %v276_v3 = vld [vmem:[#allocation5] sm:$0xff]  ;;  %v275_v4 = vld [vmem:[%s237_s13] sm:$0xff]  ;;  %s352_s11 = scalar_lea.hbm %s895_s5, %s461_s8  ;;  %s274_s28 = scalar_lea.vmem [#allocation8], %s454_s6 }
  0x32   : > { %v312_v5 = vld [vmem:[#allocation7 + $0x18] sm:$0xff]  ;;  %v311_v6 = vld [vmem:[#allocation7 + $0x10] sm:$0xff]  ;;  %v310_v7 = vld [vmem:[#allocation7 + $0x8] sm:$0xff]  ;;  %s354_s29 = sshll.u32 %s274_s28, 4  ;;  %s356_s30 = sshll.u32 %s352_s11, 4  ;;  %s355_s29 = int_to_ptr.vmem [resolvable:$true] %s354_s29  ;;  %s357_s30 = int_to_ptr.hbm [resolvable:$true] %s356_s30 }
  0x33   : > { %301 = vmatpush.msra.mxu0 %v278_v1  ;;  %332 = vmatpush.msra.mxu1 %v312_v5  ;;  %v309_v8 = vld [vmem:[#allocation7] sm:$0xff]  ;;  %v533_v9 = vld [vmem:[%s892_s2] ss:$0 sm:$0xff]  ;;  %s342_s16 = scalar_lea.sflag [#allocation4], %s833_s22  ;;  %s641_s25 = sshra.s32 %s357_s30, 4  ;;  %s642_s25 = int_to_ptr.hbm [resolvable:$true] %s641_s25 }
  0x34   : > { %v534_v13 = vld [vmem:[%s894_s4] ss:$0 sm:$0xff]  ;;  %s643_s7 = scalar_lea.hbm %s642_s25, 8  ;;  %s647_s17 = scalar_lea.hbm %s895_s5, 16 }
  0x35   : > { %302 = vmatpush.msra.mxu0 %v277_v2  ;;  %333 = vmatpush.msra.mxu1 %v311_v6  ;;  %p644_p1 = scmp.ne.s32.totalorder %s642_s25, %s643_s7  ;;  %p648_p12 = scmp.lt.s32.totalorder %s642_s25, %s895_s5 }
  0x36   : > { %p649_p7 = scmp.lt.s32.totalorder %s647_s17, %s643_s7 }
  0x37   : > { %303 = vmatpush.msra.mxu0 %v276_v3  ;;  %334 = vmatpush.msra.mxu1 %v310_v7  ;;  %p645_p3 = pnand %p644_p1, %p802_p4 }
  0x38   : > { %458 = vmatmul.msk.f32.vlgmr.msra.gmra.mxu0 %vm284_vm0, %v275_v4  ;;  %p650_p8 = por %p649_p7, %p648_p12 }
  0x39   : > { %335 = vmatpush.msra.mxu1 %v309_v8  ;;  %p646_p5 = pneg %p645_p3 }
  0x3b   : > { %p651_p9 = pnand %p650_p8, %p646_p5 }
  0xb5   : > { %v305_v10 = vpop.f32.mrf.mxu0 }
  0xb6   : > { %v306_v11 = vadd.f32 %v533_v9, %v305_v10 }
  0xb8   : > { %535 = vtanh.f32 %v306_v11 }
  0xbe   : > { %v536_v12 = vpop.eup %535 }
  0xbf   : > { %459 = vmatmul.msk.f32.vlgmr.msra.gmra.mxu1 %vm284_vm0, %v536_v12 }
 0x13c   : > { %v337_v14 = vpop.f32.mrf.mxu1 }
 0x13d   : > { %v338_v15 = vadd.f32 %v534_v13, %v337_v14 }
 0x13f   : > { %340 = vst [vmem:[%s274_s28] sm:$0xff] %v338_v15 }
 0x140   : > { %654 = shalt.err (!%p651_p9)
}
 0x141   : > { %474 = dma.vmem_to_hbm [thread:$0]  (%p802_p4), %s355_s29, 128, %s357_s30, %s342_s16  }
 0x142 PF: > { %s368_s22 = sand.u32 1, %s685_s18   ;;  %p902_p10 = scmp.ge.s32.totalorder %s697_s21, 2 }
 0x143   : > { %s369_s9 = scalar_lea.sflag [#allocation4], %s368_s22 }
 0x144   : > { %p488_p13 = pnand %p902_p10, %p806_p6 }
 0x146   : > { %p489_p11 = pneg %p488_p13 }
 0x148   : > { %680 = dma.done.wait (%p489_p11), %s369_s9, 128  }
 0x149   : > { %682 = vsyncadd (%p489_p11), %s369_s9, 4294967168  ;;  %p19_p0 = scmp.ge.s32.totalorder %s776_s12, 4   ;;  %s903_s18 = smov %s689_s19 }
 0x14a   : > { %s904_s19 = smov %s693_s20  ;;  %s905_s20 = smov %s787_s15 }
 0x14b   : > { %s906_s21 = smov %s776_s12  ;;  %21 = sbr.rel (!%p19_p0) target bundleno = 6 (0x6), region = 93 }
 0x150   :  { %375 = vsyncpa [#allocation3], 1 }
 0x151   :  { %377 = vsyncpa [#allocation3 + $0x1], 1 }
 0x152   :  { %378 = vsyncpa [#allocation6], 1 }
 0x153   :  { %379 = vsyncpa [#allocation4], 1 }
 0x154   :  { %381 = vsyncpa [#allocation4 + $0x1], 1 }

</bundles_post_ra>
